<compile_context>
chip_gen: v7x
topology: tpu7x:2x2x1
jax: 0.10.0
libtpu: 0.0.40
codegen_flags: <defaults>
</compile_context>

<pallas_src>
import jax
import jax.numpy as jnp
from jax.experimental import pallas as pl
from jax.experimental.pallas import tpu as pltpu

MAX_BLOCK_M = 1024  # rows per grid step; amortizes per-step overhead, fits VMEM


def _round_up(n, m):
    return ((n + m - 1) // m) * m


def _choose_block_m(batch):
    """Big tiles to amortize per-step overhead, but >=2 steps when possible
    so the 'parallel' grid axis can use both TensorCores on v7x."""
    if batch <= 8:
        return _round_up(batch, 8)
    half = _round_up(pl.cdiv(batch, 2), 8)
    return min(MAX_BLOCK_M, half)


def mnet_kernel(x_ref, w1_ref, b1_ref, w2_ref, b2_ref, w3_ref, b3_ref, o_ref):
    # Cast x f32 -> bf16 on the VPU (cheaper than a separate wrapper cast pass).
    x = x_ref[...].astype(jnp.bfloat16)

    # Layer 1: Linear + ReLU (bf16 MXU inputs, f32 accumulate / elementwise).
    h1 = jnp.dot(x, w1_ref[...], preferred_element_type=jnp.float32) + b1_ref[...]
    h1 = jnp.maximum(h1, 0.0)

    # Layer 2: Linear + ReLU.
    h2 = jnp.dot(h1.astype(jnp.bfloat16), w2_ref[...],
                 preferred_element_type=jnp.float32) + b2_ref[...]
    h2 = jnp.maximum(h2, 0.0)

    # Layer 3: Linear -> logits over the real out_size lanes only.
    logits = jnp.dot(h2.astype(jnp.bfloat16), w3_ref[...],
                     preferred_element_type=jnp.float32) + b3_ref[...]

    # Numerically stable LogSoftmax over the (unpadded) feature axis.
    m = jnp.max(logits, axis=1, keepdims=True)
    shifted = logits - m
    lse = jnp.log(jnp.sum(jnp.exp(shifted), axis=1, keepdims=True))
    o_ref[...] = (shifted - lse).astype(o_ref.dtype)


def mnet_forward(x, params, *, block_m=None):
    """x: (B, input_size) f32.
    params: prepared params (bf16 (in,out) weights, f32 (1,out) biases)."""
    w1, b1 = params["w1"], params["b1"]
    w2, b2 = params["w2"], params["b2"]
    w3, b3 = params["w3"], params["b3"]

    B, in_size = x.shape
    h1_size, h2_size, out_size = w1.shape[1], w2.shape[1], w3.shape[1]

    if block_m is None:
        block_m = _choose_block_m(B)
    grid = (pl.cdiv(B, block_m),)  # ragged last block is clipped by Pallas

    cost = pl.CostEstimate(
        flops=2 * B * (in_size * h1_size + h1_size * h2_size + h2_size * out_size),
        transcendentals=B * out_size,  # exp in log-softmax
        bytes_accessed=(x.size * 4
                        + (w1.size + w2.size + w3.size) * 2
                        + (b1.size + b2.size + b3.size) * 4
                        + B * out_size * 4),
    )

    return pl.pallas_call(
        mnet_kernel,
        out_shape=jax.ShapeDtypeStruct((B, out_size), jnp.float32),
        grid=grid,
        in_specs=[
            # x: tiled over batch, natural (unpadded) 32-wide last dim.
            pl.BlockSpec((block_m, in_size), lambda i: (i, 0)),
            # Weights/biases: full arrays, VMEM-resident across grid steps.
            pl.BlockSpec((in_size, h1_size), lambda i: (0, 0)),
            pl.BlockSpec((1, h1_size), lambda i: (0, 0)),
            pl.BlockSpec((h1_size, h2_size), lambda i: (0, 0)),
            pl.BlockSpec((1, h2_size), lambda i: (0, 0)),
            pl.BlockSpec((h2_size, out_size), lambda i: (0, 0)),
            pl.BlockSpec((1, out_size), lambda i: (0, 0)),
        ],
        # Narrow (real out_size) store: far fewer output bytes, no slice pass.
        out_specs=pl.BlockSpec((block_m, out_size), lambda i: (i, 0)),
        compiler_params=pltpu.CompilerParams(
            dimension_semantics=("parallel",),
        ),
        cost_estimate=cost,
    )(x, w1, b1, w2, b2, w3, b3)


def init_params(key, input_size, hidden_size, output_size):
    """Deterministic init mirroring nn.Linear; weights stored as (in, out) f32."""
    k1, k2, k3, k4, k5, k6 = jax.random.split(key, 6)
    dims = [(input_size, hidden_size[0]),
            (hidden_size[0], hidden_size[1]),
            (hidden_size[1], output_size)]
    keys_w = [k1, k2, k3]
    keys_b = [k4, k5, k6]
    params = {}
    for i, ((fan_in, fan_out), kw, kb) in enumerate(zip(dims, keys_w, keys_b), 1):
        bound = 1.0 / jnp.sqrt(jnp.float32(fan_in))
        params[f"w{i}"] = jax.random.uniform(
            kw, (fan_in, fan_out), jnp.float32, -bound, bound)
        params[f"b{i}"] = jax.random.uniform(
            kb, (1, fan_out), jnp.float32, -bound, bound)
    return params


def prepare_params(params):
    """One-time (hoisted out of forward) cast: weights -> bf16, biases -> f32."""
    out = {}
    for k, v in params.items():
        out[k] = v.astype(jnp.bfloat16) if k.startswith("w") else v.astype(jnp.float32)
    return out


def mnet_reference(x, params):
    """Plain-JAX reference matching the kernel's bf16-matmul / f32-elementwise math."""
    h = jnp.dot(x.astype(jnp.bfloat16), params["w1"],
                preferred_element_type=jnp.float32) + params["b1"]
    h = jnp.maximum(h, 0.0)
    h = jnp.dot(h.astype(jnp.bfloat16), params["w2"],
                preferred_element_type=jnp.float32) + params["b2"]
    h = jnp.maximum(h, 0.0)
    logits = jnp.dot(h.astype(jnp.bfloat16), params["w3"],
                     preferred_element_type=jnp.float32) + params["b3"]
    return jax.nn.log_softmax(logits, axis=1)


if __name__ == "__main__":
    input_size = 32
    hidden_size = (64, 48)
    output_size = 16
    batch = 200  # not a multiple of block_m: exercises the ragged last block + 2-step grid

    key = jax.random.PRNGKey(0)
    kx, kp = jax.random.split(key)
    x = jax.random.normal(kx, (batch, input_size), jnp.float32)
    params = prepare_params(init_params(kp, input_size, hidden_size, output_size))

    out = mnet_forward(x, params)
    out = jax.block_until_ready(out)

    ref = mnet_reference(x, params)
    assert out.shape == (batch, output_size)
    assert jnp.allclose(out, ref, atol=1e-4, rtol=1e-4), float(
        jnp.max(jnp.abs(out - ref)))

    print("KERNEL_OK")
</pallas_src>

<mosaic_0001>
module attributes {stable_mosaic.version = 11 : i64} {
  func.func @mnet_kernel(%arg0: i32, %arg1: memref<104x32xf32, #tpu.memory_space<vmem>>, %arg2: memref<32x64xbf16, #tpu.memory_space<vmem>>, %arg3: memref<1x64xf32, #tpu.memory_space<vmem>>, %arg4: memref<64x48xbf16, #tpu.memory_space<vmem>>, %arg5: memref<1x48xf32, #tpu.memory_space<vmem>>, %arg6: memref<48x16xbf16, #tpu.memory_space<vmem>>, %arg7: memref<1x16xf32, #tpu.memory_space<vmem>>, %arg8: memref<104x16xf32, #tpu.memory_space<vmem>>) attributes {dimension_semantics = [#tpu.dimension_semantics<parallel>], iteration_bounds = array<i64: 2>, scalar_prefetch = 0 : i64, scratch_operands = 0 : i64, tpu.core_type = #tpu.core_type<tc>, window_params = [{transform_indices = @transform_0, window_bounds = array<i64: 104, 32>}, {pipeline_mode = #tpu.pipeline_mode<synchronous>, transform_indices = @transform_1, window_bounds = array<i64: 32, 64>}, {pipeline_mode = #tpu.pipeline_mode<synchronous>, transform_indices = @transform_2, window_bounds = array<i64: 1, 64>}, {pipeline_mode = #tpu.pipeline_mode<synchronous>, transform_indices = @transform_3, window_bounds = array<i64: 64, 48>}, {pipeline_mode = #tpu.pipeline_mode<synchronous>, transform_indices = @transform_4, window_bounds = array<i64: 1, 48>}, {pipeline_mode = #tpu.pipeline_mode<synchronous>, transform_indices = @transform_5, window_bounds = array<i64: 48, 16>}, {pipeline_mode = #tpu.pipeline_mode<synchronous>, transform_indices = @transform_6, window_bounds = array<i64: 1, 16>}, {transform_indices = @transform_7, window_bounds = array<i64: 104, 16>}]} {
    %c0 = arith.constant 0 : index
    %c0_0 = arith.constant 0 : index
    %0 = vector.load %arg1[%c0, %c0_0] : memref<104x32xf32, #tpu.memory_space<vmem>>, vector<104x32xf32>
    %1 = arith.truncf %0 : vector<104x32xf32> to vector<104x32xbf16>
    %c0_1 = arith.constant 0 : index
    %c0_2 = arith.constant 0 : index
    %2 = vector.load %arg2[%c0_1, %c0_2] : memref<32x64xbf16, #tpu.memory_space<vmem>>, vector<32x64xbf16>
    %cst = arith.constant dense<0.000000e+00> : vector<104x64xf32>
    %3 = tpu.matmul %1, %2, %cst {dimension_numbers = #tpu.dot_dimension_numbers<[1], [0], [0], [1], [0, 0, 1, 1], [], []>} : vector<104x32xbf16>, vector<32x64xbf16>, vector<104x64xf32> -> vector<104x64xf32>
    %c0_3 = arith.constant 0 : index
    %c0_4 = arith.constant 0 : index
    %4 = vector.load %arg3[%c0_3, %c0_4] : memref<1x64xf32, #tpu.memory_space<vmem>>, vector<1x64xf32>
    %5 = vector.broadcast %4 : vector<1x64xf32> to vector<104x64xf32>
    %6 = arith.addf %3, %5 : vector<104x64xf32>
    %cst_5 = arith.constant 0.000000e+00 : f32
    %7 = vector.broadcast %cst_5 : f32 to vector<104x64xf32>
    %8 = arith.maximumf %6, %7 : vector<104x64xf32>
    %9 = arith.truncf %8 : vector<104x64xf32> to vector<104x64xbf16>
    %c0_6 = arith.constant 0 : index
    %c0_7 = arith.constant 0 : index
    %10 = vector.load %arg4[%c0_6, %c0_7] : memref<64x48xbf16, #tpu.memory_space<vmem>>, vector<64x48xbf16>
    %cst_8 = arith.constant dense<0.000000e+00> : vector<104x48xf32>
    %11 = tpu.matmul %9, %10, %cst_8 {dimension_numbers = #tpu.dot_dimension_numbers<[1], [0], [0], [1], [0, 0, 1, 1], [], []>} : vector<104x64xbf16>, vector<64x48xbf16>, vector<104x48xf32> -> vector<104x48xf32>
    %c0_9 = arith.constant 0 : index
    %c0_10 = arith.constant 0 : index
    %12 = vector.load %arg5[%c0_9, %c0_10] : memref<1x48xf32, #tpu.memory_space<vmem>>, vector<1x48xf32>
    %13 = vector.broadcast %12 : vector<1x48xf32> to vector<104x48xf32>
    %14 = arith.addf %11, %13 : vector<104x48xf32>
    %cst_11 = arith.constant 0.000000e+00 : f32
    %15 = vector.broadcast %cst_11 : f32 to vector<104x48xf32>
    %16 = arith.maximumf %14, %15 : vector<104x48xf32>
    %17 = arith.truncf %16 : vector<104x48xf32> to vector<104x48xbf16>
    %c0_12 = arith.constant 0 : index
    %c0_13 = arith.constant 0 : index
    %18 = vector.load %arg6[%c0_12, %c0_13] : memref<48x16xbf16, #tpu.memory_space<vmem>>, vector<48x16xbf16>
    %cst_14 = arith.constant dense<0.000000e+00> : vector<104x16xf32>
    %19 = tpu.matmul %17, %18, %cst_14 {dimension_numbers = #tpu.dot_dimension_numbers<[1], [0], [0], [1], [0, 0, 1, 1], [], []>} : vector<104x48xbf16>, vector<48x16xbf16>, vector<104x16xf32> -> vector<104x16xf32>
    %c0_15 = arith.constant 0 : index
    %c0_16 = arith.constant 0 : index
    %20 = vector.load %arg7[%c0_15, %c0_16] : memref<1x16xf32, #tpu.memory_space<vmem>>, vector<1x16xf32>
    %21 = vector.broadcast %20 : vector<1x16xf32> to vector<104x16xf32>
    %22 = arith.addf %19, %21 : vector<104x16xf32>
    %cst_17 = arith.constant dense<0xFF800000> : vector<104xf32>
    %23 = vector.multi_reduction <maximumf>, %22, %cst_17 [1] : vector<104x16xf32> to vector<104xf32>
    %24 = vector.shape_cast %23 : vector<104xf32> to vector<104x1xf32>
    %25 = vector.broadcast %24 : vector<104x1xf32> to vector<104x16xf32>
    %26 = arith.subf %22, %25 : vector<104x16xf32>
    %27 = math.exp %26 : vector<104x16xf32>
    %cst_18 = arith.constant dense<0.000000e+00> : vector<104xf32>
    %28 = vector.multi_reduction <add>, %27, %cst_18 [1] : vector<104x16xf32> to vector<104xf32>
    %29 = vector.shape_cast %28 : vector<104xf32> to vector<104x1xf32>
    %30 = math.log %29 : vector<104x1xf32>
    %31 = vector.broadcast %30 : vector<104x1xf32> to vector<104x16xf32>
    %32 = arith.subf %26, %31 : vector<104x16xf32>
    %c0_19 = arith.constant 0 : index
    %c0_20 = arith.constant 0 : index
    %33 = vector.load %arg8[%c0_19, %c0_20] : memref<104x16xf32, #tpu.memory_space<vmem>>, vector<104x16xf32>
    tpu.vector_store %arg8[%c0_19, %c0_20], %32 {strides = array<i32>} : memref<104x16xf32, #tpu.memory_space<vmem>>, vector<104x16xf32>,
    return
  }
  func.func @transform_0(%arg0: i32) -> (i32, i32) {
    %c0_i32 = arith.constant 0 : i32
    %c0_i32_0 = arith.constant 0 : i32
    return %arg0, %c0_i32 : i32, i32
  }
  func.func @transform_1(%arg0: i32) -> (i32, i32) {
    %c0_i32 = arith.constant 0 : i32
    %c0_i32_0 = arith.constant 0 : i32
    %c0_i32_1 = arith.constant 0 : i32
    return %c0_i32, %c0_i32_0 : i32, i32
  }
  func.func @transform_2(%arg0: i32) -> (i32, i32) {
    %c0_i32 = arith.constant 0 : i32
    %c0_i32_0 = arith.constant 0 : i32
    %c0_i32_1 = arith.constant 0 : i32
    return %c0_i32, %c0_i32_0 : i32, i32
  }
  func.func @transform_3(%arg0: i32) -> (i32, i32) {
    %c0_i32 = arith.constant 0 : i32
    %c0_i32_0 = arith.constant 0 : i32
    %c0_i32_1 = arith.constant 0 : i32
    return %c0_i32, %c0_i32_0 : i32, i32
  }
  func.func @transform_4(%arg0: i32) -> (i32, i32) {
    %c0_i32 = arith.constant 0 : i32
    %c0_i32_0 = arith.constant 0 : i32
    %c0_i32_1 = arith.constant 0 : i32
    return %c0_i32, %c0_i32_0 : i32, i32
  }
  func.func @transform_5(%arg0: i32) -> (i32, i32) {
    %c0_i32 = arith.constant 0 : i32
    %c0_i32_0 = arith.constant 0 : i32
    %c0_i32_1 = arith.constant 0 : i32
    return %c0_i32, %c0_i32_0 : i32, i32
  }
  func.func @transform_6(%arg0: i32) -> (i32, i32) {
    %c0_i32 = arith.constant 0 : i32
    %c0_i32_0 = arith.constant 0 : i32
    %c0_i32_1 = arith.constant 0 : i32
    return %c0_i32, %c0_i32_0 : i32, i32
  }
  func.func @transform_7(%arg0: i32) -> (i32, i32) {
    %c0_i32 = arith.constant 0 : i32
    %c0_i32_0 = arith.constant 0 : i32
    return %arg0, %c0_i32 : i32, i32
  }
}

</mosaic_0001>

<bundles_post_ra>
// kernel: tpu_custom_call.1
= control target key start
LH: loop header
LB: loop body
LE: loop exit
PB: predicated region body
PF: predicated region fallthrough
CT: control target
= control target key end

     0   :  { %s1693_s24 = smov 0   ;;  %s1695_s25 = smov 0   ;;  %s2148_s0 = inlined_call_operand.vmem [shape: f32[200,32], index: 0, kind: input, shape index: {}]   ;;  %s2149_s1 = inlined_call_operand.vmem [shape: bf16[32,64], index: 1, kind: input, shape index: {}]   ;;  %s2150_s2 = inlined_call_operand.vmem [shape: f32[1,64], index: 2, kind: input, shape index: {}]   ;;  %s2151_s3 = inlined_call_operand.vmem [shape: bf16[64,48], index: 3, kind: input, shape index: {}]   ;;  %s2152_s4 = inlined_call_operand.vmem [shape: f32[1,48], index: 4, kind: input, shape index: {}]   ;;  %s2153_s5 = inlined_call_operand.vmem [shape: bf16[48,16], index: 5, kind: input, shape index: {}]   ;;  %s2154_s6 = inlined_call_operand.vmem [shape: f32[1,16], index: 6, kind: input, shape index: {}]   ;;  %s2155_s7 = inlined_call_operand.vmem [shape: f32[200,16], index: 7, kind: output, shape index: {}]  }
   0x1   :  { %s1697_s26 = smov 0  }
   0x2 LB: > { %s1706_s27 = sadd.s32 4294967295, %s1617_s26   ;;  %s1708_s28 = sadd.s32 1, %s1617_s26   ;;  %s1617_s26 = sphi %s1697_s26, %s2162_s26   ;;  %s1613_s25 = sphi %s1695_s25, %s2161_s25   ;;  %s1609_s24 = sphi %s1693_s24, %s2160_s24  }
   0x3   : > { %s173_s29 = ssub.s32 %s1617_s26, %s1708_s28  ;;  %s176_s30 = sadd.s32 1, %s1613_s25 }
   0x4   : > { %p174_p0 = scmp.eq.s32.totalorder %s173_s29, 0  ;;  %p186_p1 = scmp.ne.s32.totalorder %s1613_s25, %s1609_s24 }
   0x5   : > { %p187_p2 = scmp.eq.s32.totalorder %s1706_s27, 1  ;;  %p1222_p3 = scmp.ge.s32.totalorder %s1617_s26, 1 }
   0x6   : > { %s1716_s8 = scalar_select %p174_p0, %s1613_s25, %s176_s30  }
   0x7   : > { %p1718_p4 = por %p187_p2, %p186_p1  ;;  %p246_p5 = scmp.lt.s32.totalorder %s1617_s26, 3 }
   0x9   : > { %p247_p6 = pnand %p1222_p3, %p246_p5 }
   0xa   : > { %v1498_v0 = vld [vmem:[%s2149_s1] sm:$0xff] (!%p247_p6)   ;;  %v1651_v1 = vmov (!%p247_p6), 0.0   ;;  %v1499_v2 = vld [vmem:[%s2149_s1 + $0x8] sm:$0xff] (!%p247_p6)   ;;  %vm1652_vm0 = vmmov (!%p247_p6), 0   ;;  %s1733_s14 = smul.u32 (!%p247_p6), 13, %s1706_s27  ;;  %vm344_vm1 = vcmask (!%p247_p6), 261120  }
   0xb   : > { %250 = sbr.rel (%p247_p6) target bundleno = 1105 (0x451), region = 48  ;;  %1300 = vmatprep.subr.bf16.mxu0 (!%p247_p6), %v1651_v1  ;;  %1402 = vmatprep.subr.bf16.mxu1 (!%p247_p6), %v1651_v1  ;;  %v1500_v8 = vld [vmem:[%s2151_s3] sm:$0xff] (!%p247_p6)   ;;  %v1501_v15 = vld [vmem:[%s2151_s3 + $0x8] sm:$0xff] (!%p247_p6)   ;;  %v1502_v17 = vld [vmem:[%s2151_s3 + $0x10] sm:$0xff] (!%p247_p6)   ;;  %vm513_vm2 = vcmask (!%p247_p6), 523264   ;;  %vm674_vm3 = vcmask (!%p247_p6), 392192  }
   0xc   : > { %1301 = vmatpush3.bf16.msra.mxu0 (!%p247_p6), %v1498_v0  ;;  %1304 = vmatprep.mubr.msk.bf16.mxu0 (!%p247_p6), %vm1652_vm0, %v1651_v1  ;;  %p286_p7 = scmp.lt.s32.totalorder (!%p247_p6), %s1733_s14, 24  ;;  %v1503_v26 = vld [vmem:[%s2151_s3 + $0x18] sm:$0xff] (!%p247_p6)   ;;  %v1504_v27 = vld [vmem:[%s2153_s5] sm:$0xff] (!%p247_p6)   ;;  %v1505_v28 = vld [vmem:[%s2153_s5 + $0x8] sm:$0xff] (!%p247_p6)   ;;  %vm784_vm4 = vcmask (!%p247_p6), 130048   ;;  %s278_s26 = sand.u32 (!%p247_p6), 1, %s1609_s24  }
   0xd   : > { %1302 = vmatprep.subr.bf16.mxu0 (!%p247_p6), %v1651_v1  ;;  %1404 = vmatpush3.bf16.msra.mxu1 (!%p247_p6), %v1498_v0  ;;  %v1506_v29 = vld [vmem:[%s2153_s5 + $0x10] sm:$0xff] (!%p247_p6)   ;;  %v1811_v30 = vld [vmem:[%s2150_s2] ss:$0 sm:$0xff] (!%p247_p6)  ;;  %s1406_s29 = smul.u32 (!%p247_p6), 104, %s278_s26 }
   0xe   : > { %1403 = vmatprep.subr.bf16.mxu1 (!%p247_p6), %v1651_v1  ;;  %1320 = vmatprep.mubr.msk.bf16.mxu1 (!%p247_p6), %vm1652_vm0, %v1651_v1 }
   0xf   : > { %s2019_s30 = scalar_lea.vmem (!%p247_p6), [#allocation2], %s1406_s29  }
  0x10   : > { %1303 = vmatpush3.bf16.msra.mxu0 (!%p247_p6), %v1499_v2 }
  0x11   : > { %1405 = vmatpush3.bf16.msra.mxu1 (!%p247_p6), %v1499_v2  ;;  %1368 = vmatprep.subr.bf16.mxu0 (!%p247_p6), %v1651_v1 }
  0x12   : > { %s287_s15 = scalar_select %p286_p7, %s1733_s14, 24  ;;  %1332 = vmatprep.subr.bf16.mxu1 %v1651_v1 }
  0x13   : > { %s962_s24 = ssub.s32 (%p1718_p4), 25, %s1733_s14  ;;  %s1269_s10 = smul.u32 (%p1718_p4), 104, %s1706_s27 }
  0x14   : > { %s1223_s16 = sshll.u32 %s287_s15, 3  ;;  %p963_p8 = scmp.lt.s32.totalorder (%p1718_p4), %s962_s24, 13 }
  0x15   : > { %s1746_s19 = scalar_lea.vmem %s2148_s0, %s1223_s16  ;;  %s2066_s13 = scalar_lea.vmem (%p1718_p4), %s2155_s7, %s1269_s10  }
  0x16   : > { %v301_v3 = vld [vmem:[%s1746_s19] sm:$0xff]  ;;  %v302_v4 = vld [vmem:[%s1746_s19 + $0x8] sm:$0xff]  ;;  %v303_v9 = vld [vmem:[%s1746_s19 + $0x10] sm:$0xff] }
  0x17   : > { %v314_v5 = vpack.c.bf16 %v302_v4, %v301_v3  ;;  %v309_v6 = vld [vmem:[%s1746_s19 + $0x40] sm:$0xff]  ;;  %v310_v7 = vld [vmem:[%s1746_s19 + $0x48] sm:$0xff]  ;;  %v304_v10 = vld [vmem:[%s1746_s19 + $0x18] sm:$0xff] }
  0x18   : > { %v318_v11 = vpack.c.bf16 %v310_v7, %v309_v6  ;;  %v315_v12 = vpack.c.bf16 %v304_v10, %v303_v9  ;;  %v311_v13 = vld [vmem:[%s1746_s19 + $0x50] sm:$0xff]  ;;  %v312_v14 = vld [vmem:[%s1746_s19 + $0x58] sm:$0xff]  ;;  %v305_v18 = vld [vmem:[%s1746_s19 + $0x20] sm:$0xff] }
  0x19   : > { %1305 = vmatmul.mubr.msk.bf16.vlgmr.msra.gmra.mrb[0].mxu0 %vm344_vm1, %v314_v5  ;;  %v319_v16 = vpack.c.bf16 %v312_v14, %v311_v13  ;;  %v306_v19 = vld [vmem:[%s1746_s19 + $0x28] sm:$0xff]  ;;  %v313_v21 = vld [vmem:[%s1746_s19 + $0x60] sm:$0xff]  ;;  %v307_v23 = vld [vmem:[%s1746_s19 + $0x30] sm:$0xff] }
  0x1a   : > { %1308 = vmatprep.mubr.msk.bf16.mxu0 %vm1652_vm0, %v1651_v1  ;;  %1321 = vmatmul.mubr.msk.bf16.vlgmr.msra.gmra.mrb[0].mxu1 %vm344_vm1, %v318_v11  ;;  %v316_v20 = vpack.c.bf16 %v306_v19, %v305_v18  ;;  %v320_v22 = vpack.c.bf16 %v313_v21, %v313_v21  ;;  %v308_v24 = vld [vmem:[%s1746_s19 + $0x38] sm:$0xff] }
  0x1b   : > { %1324 = vmatprep.mubr.msk.bf16.mxu1 %vm1652_vm0, %v1651_v1  ;;  %1333 = vmatpush3.bf16.msra.mxu1 %v1500_v8  ;;  %v317_v25 = vpack.c.bf16 %v308_v24, %v307_v23 }
  0x1c   : > { %1334 = vmatprep.subr.bf16.mxu1 %v1651_v1  ;;  %1369 = vmatpush3.bf16.msra.mxu0 %v1504_v27 }
  0x1d   : > { %1370 = vmatprep.subr.bf16.mxu0 %v1651_v1 }
  0x1f   : > { %1335 = vmatpush3.bf16.msra.mxu1 %v1501_v15 }
  0x20   : > { %1336 = vmatprep.subr.bf16.mxu1 %v1651_v1  ;;  %1371 = vmatpush3.bf16.msra.mxu0 %v1505_v28 }
  0x21   : > { %1309 = vmatmul.mubr.msk.bf16.gmra.mrb[4].mxu0 %vm344_vm1, %v315_v12  ;;  %1372 = vmatprep.subr.bf16.mxu0 %v1651_v1 }
  0x22   : > { %1312 = vmatprep.mubr.msk.bf16.mxu0 %vm1652_vm0, %v1651_v1  ;;  %1325 = vmatmul.mubr.msk.bf16.gmra.mrb[4].mxu1 %vm344_vm1, %v319_v16 }
  0x23   : > { %1328 = vmatprep.mubr.msk.bf16.mxu1 %vm1652_vm0, %v1651_v1  ;;  %1337 = vmatpush3.bf16.msra.mxu1 %v1502_v17 }
  0x24   : > { %1338 = vmatprep.subr.bf16.mxu1 %v1651_v1  ;;  %1373 = vmatpush3.bf16.msra.mxu0 %v1506_v29  ;;  %v1848_v29 = vld [vmem:[%s2152_s4] ss:$0 sm:$0xff] }
  0x27   : > { %1339 = vmatpush3.bf16.msra.mxu1 %v1503_v26 }
  0x29   : > { %1313 = vmatmul.mubr.msk.bf16.gmra.mrb[8].mxu0 %vm344_vm1, %v316_v20 }
  0x2a   : > { %1316 = vmatprep.mubr.msk.bf16.mxu0 %vm1652_vm0, %v1651_v1  ;;  %1329 = vmatmul.mubr.msk.bf16.gmra.mrb[8].mxu1 %vm344_vm1, %v320_v22 }
  0x2b   : > { %1340 = vmatprep.mubr.msk.bf16.mxu1 %vm1652_vm0, %v1651_v1 }
  0x31   : > { %1317 = vmatmul.mubr.msk.bf16.gmra.mrb[12].mxu0 %vm344_vm1, %v317_v25 }
  0x32   : > { %1374 = vmatprep.mubr.msk.bf16.mxu0 %vm1652_vm0, %v1651_v1 }
  0xec   : > { %v400_v31 = vpop.f32.mrb[0].mxu0 }
  0xed   : > { %v401_v32 = vadd.f32 %v1811_v30, %v400_v31  ;;  %v1306_v33 = vpop.f32.mrb[1].mxu0  ;;  %v432_v37 = vpop.f32.mrb[0].mxu1 }
  0xee   : > { %v403_v34 = vpop.f32.mrb[2].mxu0  ;;  %v433_v38 = vadd.f32 %v1811_v30, %v432_v37  ;;  %v1322_v39 = vpop.f32.mrb[1].mxu1 }
  0xef   : > { %v404_v35 = vadd.f32 %v1811_v30, %v403_v34  ;;  %v1307_v36 = vpop.f32.mrb[3].mxu0  ;;  %v454_v40 = vmax.f32 %v401_v32, 0.0  ;;  %v435_v42 = vpop.f32.mrb[2].mxu1 }
  0xf0   : > { %v462_v43 = vmax.f32 %v433_v38, 0.0  ;;  %v436_v44 = vadd.f32 %v1811_v30, %v435_v42  ;;  %v1323_v45 = vpop.f32.mrb[3].mxu1 }
  0xf1   : > { %v455_v41 = vmax.f32 %v404_v35, 0.0 }
  0xf2   : > { %v463_v48 = vmax.f32 %v436_v44, 0.0 }
  0xf3   : > { %v467_v46 = vpack.c.bf16 %v455_v41, %v454_v40 }
  0xf4   : > { %v408_v47 = vpop.f32.mrb[4].mxu0  ;;  %v471_v52 = vpack.c.bf16 %v463_v48, %v462_v43 }
  0xf5   : > { %v409_v49 = vadd.f32 %v1811_v30, %v408_v47  ;;  %v1310_v50 = vpop.f32.mrb[5].mxu0  ;;  %1341 = vmatmul.mubr.msk.bf16.vlgmr.msra.gmra.mrb[12].mxu1 %vm513_vm2, %v467_v46  ;;  %v440_v55 = vpop.f32.mrb[4].mxu1 }
  0xf6   : > { %v411_v51 = vpop.f32.mrb[6].mxu0  ;;  %1344 = vmatprep.mubr.msk.bf16.mxu1 %vm1652_vm0, %v1651_v1  ;;  %v441_v56 = vadd.f32 %v1811_v30, %v440_v55  ;;  %v1326_v57 = vpop.f32.mrb[5].mxu1 }
  0xf7   : > { %v412_v53 = vadd.f32 %v1811_v30, %v411_v51  ;;  %v1311_v54 = vpop.f32.mrb[7].mxu0  ;;  %v456_v58 = vmax.f32 %v409_v49, 0.0  ;;  %v443_v60 = vpop.f32.mrb[6].mxu1 }
  0xf8   : > { %v464_v61 = vmax.f32 %v441_v56, 0.0  ;;  %v444_v62 = vadd.f32 %v1811_v30, %v443_v60  ;;  %v1327_v63 = vpop.f32.mrb[7].mxu1 }
  0xf9   : > { %v457_v59 = vmax.f32 %v412_v53, 0.0 }
  0xfa   : > { %v465_v3 = vmax.f32 %v444_v62, 0.0 }
  0xfb   : > { %v468_v0 = vpack.c.bf16 %v457_v59, %v456_v58 }
  0xfc   : > { %v416_v2 = vpop.f32.mrb[8].mxu0  ;;  %v472_v7 = vpack.c.bf16 %v465_v3, %v464_v61 }
  0xfd   : > { %v417_v4 = vadd.f32 %v1811_v30, %v416_v2  ;;  %v1314_v5 = vpop.f32.mrb[9].mxu0  ;;  %1345 = vmatmul.mubr.msk.bf16.gmra.mrb[16].mxu1 %vm513_vm2, %v468_v0  ;;  %v448_v10 = vpop.f32.mrb[8].mxu1 }
  0xfe   : > { %v419_v6 = vpop.f32.mrb[10].mxu0  ;;  %1348 = vmatprep.mubr.msk.bf16.mxu1 %vm1652_vm0, %v1651_v1  ;;  %v1330_v11 = vpop.f32.mrb[9].mxu1  ;;  %v449_v26 = vadd.f32 %v1811_v30, %v448_v10 }
  0xff   : > { %v420_v8 = vadd.f32 %v1811_v30, %v419_v6  ;;  %v1315_v9 = vpop.f32.mrb[11].mxu0  ;;  %v458_v12 = vmax.f32 %v417_v4, 0.0  ;;  %v451_v14 = vpop.f32.mrb[10].mxu1 }
 0x100   : > { %v1331_v15 = vpop.f32.mrb[11].mxu1  ;;  %v466_v27 = vmax.f32 %v449_v26, 0.0 }
 0x101   : > { %v459_v13 = vmax.f32 %v420_v8, 0.0 }
 0x102   : > { %v473_v28 = vpack.c.bf16 %v466_v27, %v466_v27 }
 0x103   : > { %v469_v16 = vpack.c.bf16 %v459_v13, %v458_v12 }
 0x104   : > { %v424_v17 = vpop.f32.mrb[12].mxu0 }
 0x105   : > { %v425_v18 = vadd.f32 %v1811_v30, %v424_v17  ;;  %v1318_v19 = vpop.f32.mrb[13].mxu0  ;;  %1349 = vmatmul.mubr.msk.bf16.gmra.mrb[20].mxu1 %vm513_vm2, %v469_v16 }
 0x106   : > { %v427_v20 = vpop.f32.mrb[14].mxu0  ;;  %1352 = vmatprep.mubr.msk.bf16.mxu1 %vm1652_vm0, %v1651_v1 }
 0x107   : > { %v428_v21 = vadd.f32 %v1811_v30, %v427_v20  ;;  %v1319_v22 = vpop.f32.mrb[15].mxu0  ;;  %v460_v23 = vmax.f32 %v425_v18, 0.0 }
 0x109   : > { %v461_v24 = vmax.f32 %v428_v21, 0.0 }
 0x10b   : > { %v470_v25 = vpack.c.bf16 %v461_v24, %v460_v23 }
 0x10d   : > { %1353 = vmatmul.mubr.msk.bf16.gmra.mrb[24].mxu1 %vm513_vm2, %v470_v25 }
 0x10e   : > { %1356 = vmatprep.mubr.msk.bf16.mxu1 %vm1652_vm0, %v1651_v1 }
 0x115   : > { %1357 = vmatmul.mubr.msk.bf16.gmra.mrb[28].mxu1 %vm513_vm2, %v471_v52 }
 0x116   : > { %1360 = vmatprep.mubr.msk.bf16.mxu1 %vm1652_vm0, %v1651_v1 }
 0x11d   : > { %1361 = vmatmul.mubr.msk.bf16.gmra.mrb[32].mxu1 %vm513_vm2, %v472_v7 }
 0x11e   : > { %1364 = vmatprep.mubr.msk.bf16.mxu1 %vm1652_vm0, %v1651_v1 }
 0x125   : > { %1365 = vmatmul.mubr.msk.bf16.gmra.mrb[36].mxu1 %vm513_vm2, %v473_v28  ;;  %v1885_v28 = vld [vmem:[%s2154_s6] ss:$0 sm:$0xff] }
 0x1c8   : > { %v569_v31 = vpop.f32.mrb[12].mxu1 }
 0x1c9   : > { %v570_v32 = vadd.f32 %v1848_v29, %v569_v31  ;;  %v1342_v33 = vpop.f32.mrb[13].mxu1 }
 0x1ca   : > { %v572_v34 = vpop.f32.mrb[14].mxu1 }
 0x1cb   : > { %v573_v30 = vadd.f32 %v1848_v29, %v572_v34  ;;  %v1343_v35 = vpop.f32.mrb[15].mxu1  ;;  %v623_v36 = vmax.f32 %v570_v32, 0.0 }
 0x1cd   : > { %v624_v37 = vmax.f32 %v573_v30, 0.0 }
 0x1cf   : > { %v636_v38 = vpack.c.bf16 %v624_v37, %v623_v36 }
 0x1d0   : > { %v577_v39 = vpop.f32.mrb[16].mxu1 }
 0x1d1   : > { %v578_v40 = vadd.f32 %v1848_v29, %v577_v39  ;;  %v1346_v41 = vpop.f32.mrb[17].mxu1  ;;  %1375 = vmatmul.mubr.msk.bf16.vlgmr.msra.gmra.mrb[16].mxu0 %vm674_vm3, %v636_v38 }
 0x1d2   : > { %v580_v42 = vpop.f32.mrb[18].mxu1  ;;  %1378 = vmatprep.mubr.msk.bf16.mxu0 %vm1652_vm0, %v1651_v1 }
 0x1d3   : > { %v581_v43 = vadd.f32 %v1848_v29, %v580_v42  ;;  %v1347_v44 = vpop.f32.mrb[19].mxu1  ;;  %v625_v45 = vmax.f32 %v578_v40, 0.0 }
 0x1d5   : > { %v626_v46 = vmax.f32 %v581_v43, 0.0 }
 0x1d7   : > { %v637_v47 = vpack.c.bf16 %v626_v46, %v625_v45 }
 0x1d8   : > { %v585_v48 = vpop.f32.mrb[20].mxu1 }
 0x1d9   : > { %v586_v49 = vadd.f32 %v1848_v29, %v585_v48  ;;  %v1350_v50 = vpop.f32.mrb[21].mxu1  ;;  %1379 = vmatmul.mubr.msk.bf16.gmra.mrb[20].mxu0 %vm674_vm3, %v637_v47 }
 0x1da   : > { %v588_v51 = vpop.f32.mrb[22].mxu1  ;;  %1382 = vmatprep.mubr.msk.bf16.mxu0 %vm1652_vm0, %v1651_v1 }
 0x1db   : > { %v589_v52 = vadd.f32 %v1848_v29, %v588_v51  ;;  %v1351_v53 = vpop.f32.mrb[23].mxu1  ;;  %v627_v54 = vmax.f32 %v586_v49, 0.0 }
 0x1dd   : > { %v628_v55 = vmax.f32 %v589_v52, 0.0 }
 0x1df   : > { %v638_v56 = vpack.c.bf16 %v628_v55, %v627_v54 }
 0x1e0   : > { %v593_v57 = vpop.f32.mrb[24].mxu1 }
 0x1e1   : > { %v594_v58 = vadd.f32 %v1848_v29, %v593_v57  ;;  %v1354_v59 = vpop.f32.mrb[25].mxu1  ;;  %1383 = vmatmul.mubr.msk.bf16.gmra.mrb[24].mxu0 %vm674_vm3, %v638_v56 }
 0x1e2   : > { %v596_v60 = vpop.f32.mrb[26].mxu1  ;;  %1386 = vmatprep.mubr.msk.bf16.mxu0 %vm1652_vm0, %v1651_v1 }
 0x1e3   : > { %v597_v61 = vadd.f32 %v1848_v29, %v596_v60  ;;  %v1355_v62 = vpop.f32.mrb[27].mxu1  ;;  %v629_v63 = vmax.f32 %v594_v58, 0.0 }
 0x1e5   : > { %v630_v0 = vmax.f32 %v597_v61, 0.0 }
 0x1e7   : > { %v639_v2 = vpack.c.bf16 %v630_v0, %v629_v63 }
 0x1e8   : > { %v601_v3 = vpop.f32.mrb[28].mxu1 }
 0x1e9   : > { %v602_v4 = vadd.f32 %v1848_v29, %v601_v3  ;;  %v1358_v5 = vpop.f32.mrb[29].mxu1  ;;  %1387 = vmatmul.mubr.msk.bf16.gmra.mrb[28].mxu0 %vm674_vm3, %v639_v2 }
 0x1ea   : > { %v604_v6 = vpop.f32.mrb[30].mxu1  ;;  %1390 = vmatprep.mubr.msk.bf16.mxu0 %vm1652_vm0, %v1651_v1 }
 0x1eb   : > { %v605_v7 = vadd.f32 %v1848_v29, %v604_v6  ;;  %v1359_v8 = vpop.f32.mrb[31].mxu1  ;;  %v631_v9 = vmax.f32 %v602_v4, 0.0 }
 0x1ed   : > { %v632_v10 = vmax.f32 %v605_v7, 0.0 }
 0x1ef   : > { %v640_v11 = vpack.c.bf16 %v632_v10, %v631_v9 }
 0x1f0   : > { %v609_v12 = vpop.f32.mrb[32].mxu1 }
 0x1f1   : > { %v610_v13 = vadd.f32 %v1848_v29, %v609_v12  ;;  %v1362_v14 = vpop.f32.mrb[33].mxu1  ;;  %1391 = vmatmul.mubr.msk.bf16.gmra.mrb[32].mxu0 %vm674_vm3, %v640_v11 }
 0x1f2   : > { %v612_v15 = vpop.f32.mrb[34].mxu1  ;;  %1394 = vmatprep.mubr.msk.bf16.mxu0 %vm1652_vm0, %v1651_v1 }
 0x1f3   : > { %v613_v16 = vadd.f32 %v1848_v29, %v612_v15  ;;  %v1363_v17 = vpop.f32.mrb[35].mxu1  ;;  %v633_v18 = vmax.f32 %v610_v13, 0.0 }
 0x1f5   : > { %v634_v19 = vmax.f32 %v613_v16, 0.0 }
 0x1f7   : > { %v641_v20 = vpack.c.bf16 %v634_v19, %v633_v18 }
 0x1f8   : > { %v617_v21 = vpop.f32.mrb[36].mxu1 }
 0x1f9   : > { %v618_v22 = vadd.f32 %v1848_v29, %v617_v21  ;;  %v1366_v23 = vpop.f32.mrb[37].mxu1  ;;  %1395 = vmatmul.mubr.msk.bf16.gmra.mrb[36].mxu0 %vm674_vm3, %v641_v20 }
 0x1fa   : > { %v620_v24 = vpop.f32.mrb[38].mxu1  ;;  %1398 = vmatprep.mubr.msk.bf16.mxu0 %vm1652_vm0, %v1651_v1 }
 0x1fb   : > { %v635_v25 = vmax.f32 %v618_v22, 0.0  ;;  %v1367_v26 = vpop.f32.mrb[39].mxu1 }
 0x1fd   : > { %v642_v27 = vpack.c.bf16 %v635_v25, %v635_v25 }
 0x201   : > { %1399 = vmatmul.mubr.msk.bf16.gmra.mrb[40].mxu0 %vm674_vm3, %v642_v27 }
 0x2a4   : > { %v730_v31 = vpop.f32.mrb[16].mxu0 }
 0x2a5   : > { %v1888_v29 = vadd.f32 %v1885_v28, %v730_v31  ;;  %v1376_v32 = vpop.f32.mrb[17].mxu0 }
 0x2a6   : > { %v733_v33 = vpop.f32.mrb[18].mxu0 }
 0x2a7   : > { %v1891_v34 = vadd.f32 %v1885_v28, %v733_v33  ;;  %v1377_v1 = vpop.f32.mrb[19].mxu0  ;;  %v785_v30 = vsel %vm784_vm4, %v1888_v29, -inf }
 0x2a8   : > { %786 = vmax.xlane.f32.xlu0 %v785_v30 }
 0x2a9   : > { %v788_v35 = vsel %vm784_vm4, %v1891_v34, -inf }
 0x2ac   : > { %789 = vmax.xlane.f32.xlu0 %v788_v35  ;;  %v738_v36 = vpop.f32.mrb[20].mxu0 }
 0x2ad   : > { %v1898_v37 = vadd.f32 %v1885_v28, %v738_v36  ;;  %v1380_v38 = vpop.f32.mrb[21].mxu0 }
 0x2ae   : > { %v741_v39 = vpop.f32.mrb[22].mxu0 }
 0x2af   : > { %v1901_v40 = vadd.f32 %v1885_v28, %v741_v39  ;;  %v1381_v41 = vpop.f32.mrb[23].mxu0  ;;  %v791_v42 = vsel %vm784_vm4, %v1898_v37, -inf }
 0x2b0   : > { %792 = vmax.xlane.f32.xlu1 %v791_v42 }
 0x2b1   : > { %v794_v43 = vsel %vm784_vm4, %v1901_v40, -inf }
 0x2b4   : > { %795 = vmax.xlane.f32.xlu1 %v794_v43  ;;  %v746_v44 = vpop.f32.mrb[24].mxu0 }
 0x2b5   : > { %v1908_v45 = vadd.f32 %v1885_v28, %v746_v44  ;;  %v1384_v46 = vpop.f32.mrb[25].mxu0 }
 0x2b6   : > { %v749_v47 = vpop.f32.mrb[26].mxu0 }
 0x2b7   : > { %v1911_v48 = vadd.f32 %v1885_v28, %v749_v47  ;;  %v1385_v49 = vpop.f32.mrb[27].mxu0  ;;  %v797_v50 = vsel %vm784_vm4, %v1908_v45, -inf }
 0x2b8   : > { %798 = vmax.xlane.f32.xlu0 %v797_v50 }
 0x2b9   : > { %v800_v51 = vsel %vm784_vm4, %v1911_v48, -inf }
 0x2ba   : > { %801 = vmax.xlane.f32.xlu1 %v800_v51 }
 0x2bc   : > { %v754_v52 = vpop.f32.mrb[28].mxu0 }
 0x2bd   : > { %v1918_v53 = vadd.f32 %v1885_v28, %v754_v52  ;;  %v1388_v54 = vpop.f32.mrb[29].mxu0 }
 0x2be   : > { %v757_v55 = vpop.f32.mrb[30].mxu0 }
 0x2bf   : > { %v1921_v56 = vadd.f32 %v1885_v28, %v757_v55  ;;  %v1389_v57 = vpop.f32.mrb[31].mxu0  ;;  %v803_v58 = vsel %vm784_vm4, %v1918_v53, -inf }
 0x2c0   : > { %804 = vmax.xlane.f32.xlu0 %v803_v58 }
 0x2c1   : > { %v806_v59 = vsel %vm784_vm4, %v1921_v56, -inf }
 0x2c2   : > { %807 = vmax.xlane.f32.xlu1 %v806_v59 }
 0x2c4   : > { %v762_v60 = vpop.f32.mrb[32].mxu0 }
 0x2c5   : > { %v1928_v61 = vadd.f32 %v1885_v28, %v762_v60  ;;  %v1392_v62 = vpop.f32.mrb[33].mxu0 }
 0x2c6   : > { %v765_v63 = vpop.f32.mrb[34].mxu0 }
 0x2c7   : > { %v1931_v0 = vadd.f32 %v1885_v28, %v765_v63  ;;  %v1393_v2 = vpop.f32.mrb[35].mxu0  ;;  %v809_v3 = vsel %vm784_vm4, %v1928_v61, -inf }
 0x2c8   : > { %810 = vmax.xlane.f32.xlu0 %v809_v3 }
 0x2c9   : > { %v812_v4 = vsel %vm784_vm4, %v1931_v0, -inf }
 0x2ca   : > { %813 = vmax.xlane.f32.xlu1 %v812_v4 }
 0x2cc   : > { %v770_v5 = vpop.f32.mrb[36].mxu0 }
 0x2cd   : > { %v1938_v6 = vadd.f32 %v1885_v28, %v770_v5  ;;  %v1396_v7 = vpop.f32.mrb[37].mxu0 }
 0x2ce   : > { %v773_v8 = vpop.f32.mrb[38].mxu0 }
 0x2cf   : > { %v1941_v9 = vadd.f32 %v1885_v28, %v773_v8  ;;  %v1397_v10 = vpop.f32.mrb[39].mxu0  ;;  %v815_v11 = vsel %vm784_vm4, %v1938_v6, -inf }
 0x2d0   : > { %816 = vmax.xlane.f32.xlu0 %v815_v11 }
 0x2d1   : > { %v818_v12 = vsel %vm784_vm4, %v1941_v9, -inf }
 0x2d2   : > { %819 = vmax.xlane.f32.xlu1 %v818_v12 }
 0x2d4   : > { %v778_v13 = vpop.f32.mrb[40].mxu0 }
 0x2d5   : > { %v1948_v14 = vadd.f32 %v1885_v28, %v778_v13  ;;  %v1400_v15 = vpop.f32.mrb[41].mxu0 }
 0x2d6   : > { %v781_v16 = vpop.f32.mrb[42].mxu0 }
 0x2d7   : > { %v1401_v17 = vpop.f32.mrb[43].mxu0  ;;  %v821_v18 = vsel %vm784_vm4, %v1948_v14, -inf }
 0x2d8   : > { %822 = vmax.xlane.f32.xlu0 %v821_v18 }
 0x335   : > { %v787_v19 = vpop.xlane.xlu0 %786 }
 0x336   : > { %v1953_v20 = vsub.f32 %v1888_v29, %v787_v19 }
 0x338   : > { %v837_v21 = vmul.f32 1.442695, %v1953_v20 }
 0x339   : > { %v790_v22 = vpop.xlane.xlu0 %789 }
 0x33a   : > { %1507 = vpow2.f32 %v837_v21  ;;  %v1957_v23 = vsub.f32 %v1891_v34, %v790_v22 }
 0x33c   : > { %v839_v24 = vmul.f32 1.442695, %v1957_v23 }
 0x33d   : > { %v793_v25 = vpop.xlane.xlu1 %792 }
 0x33e   : > { %1509 = vpow2.f32 %v839_v24  ;;  %v1961_v26 = vsub.f32 %v1898_v37, %v793_v25 }
 0x340   : > { %v841_v27 = vmul.f32 1.442695, %v1961_v26 }
 0x341   : > { %v796_v28 = vpop.xlane.xlu1 %795 }
 0x342   : > { %1511 = vpow2.f32 %v841_v27  ;;  %v1965_v31 = vsub.f32 %v1901_v40, %v796_v28 }
 0x344   : > { %v1508_v29 = vpop.eup %1507  ;;  %v843_v32 = vmul.f32 1.442695, %v1965_v31 }
 0x345   : > { %v799_v33 = vpop.xlane.xlu0 %798  ;;  %v863_v34 = vsel %vm784_vm4, %v1508_v29, 0.0 }
 0x346   : > { %1513 = vpow2.f32 %v843_v32  ;;  %v1970_v1 = vsub.f32 %v1908_v45, %v799_v33  ;;  %864 = vadd.xlane.f32.xlu1 %v863_v34 }
 0x347   : > { %v802_v30 = vpop.xlane.xlu1 %801 }
 0x348   : > { %v1510_v35 = vpop.eup %1509  ;;  %v845_v36 = vmul.f32 1.442695, %v1970_v1  ;;  %v1974_v37 = vsub.f32 %v1911_v48, %v802_v30 }
 0x349   : > { %v866_v38 = vsel %vm784_vm4, %v1510_v35, 0.0 }
 0x34a   : > { %1515 = vpow2.f32 %v845_v36  ;;  %v847_v39 = vmul.f32 1.442695, %v1974_v37  ;;  %867 = vadd.xlane.f32.xlu0 %v866_v38 }
 0x34c   : > { %v1512_v40 = vpop.eup %1511  ;;  %1517 = vpow2.f32 %v847_v39 }
 0x34d   : > { %v805_v41 = vpop.xlane.xlu0 %804  ;;  %v869_v42 = vsel %vm784_vm4, %v1512_v40, 0.0 }
 0x34e   : > { %v1980_v43 = vsub.f32 %v1918_v53, %v805_v41  ;;  %870 = vadd.xlane.f32.xlu1 %v869_v42 }
 0x34f   : > { %v808_v44 = vpop.xlane.xlu1 %807 }
 0x350   : > { %v1514_v45 = vpop.eup %1513  ;;  %v849_v46 = vmul.f32 1.442695, %v1980_v43  ;;  %v1984_v47 = vsub.f32 %v1921_v56, %v808_v44 }
 0x351   : > { %v872_v48 = vsel %vm784_vm4, %v1514_v45, 0.0 }
 0x352   : > { %1519 = vpow2.f32 %v849_v46  ;;  %v851_v49 = vmul.f32 1.442695, %v1984_v47  ;;  %873 = vadd.xlane.f32.xlu0 %v872_v48 }
 0x354   : > { %v1516_v50 = vpop.eup %1515  ;;  %1521 = vpow2.f32 %v851_v49 }
 0x355   : > { %v811_v51 = vpop.xlane.xlu0 %810  ;;  %v875_v52 = vsel %vm784_vm4, %v1516_v50, 0.0 }
 0x356   : > { %v1518_v53 = vpop.eup %1517  ;;  %v1990_v54 = vsub.f32 %v1928_v61, %v811_v51  ;;  %876 = vadd.xlane.f32.xlu1 %v875_v52 }
 0x357   : > { %v814_v55 = vpop.xlane.xlu1 %813  ;;  %v878_v56 = vsel %vm784_vm4, %v1518_v53, 0.0 }
 0x358   : > { %v853_v57 = vmul.f32 1.442695, %v1990_v54  ;;  %v1995_v58 = vsub.f32 %v1931_v0, %v814_v55  ;;  %879 = vadd.xlane.f32.xlu0 %v878_v56 }
 0x35a   : > { %1523 = vpow2.f32 %v853_v57  ;;  %v855_v59 = vmul.f32 1.442695, %v1995_v58 }
 0x35c   : > { %v1520_v60 = vpop.eup %1519  ;;  %1525 = vpow2.f32 %v855_v59 }
 0x35d   : > { %v817_v62 = vpop.xlane.xlu0 %816  ;;  %v881_v63 = vsel %vm784_vm4, %v1520_v60, 0.0 }
 0x35e   : > { %v1522_v61 = vpop.eup %1521  ;;  %v2000_v2 = vsub.f32 %v1938_v6, %v817_v62  ;;  %882 = vadd.xlane.f32.xlu1 %v881_v63 }
 0x35f   : > { %v820_v3 = vpop.xlane.xlu1 %819  ;;  %v884_v4 = vsel %vm784_vm4, %v1522_v61, 0.0 }
 0x360   : > { %v857_v0 = vmul.f32 1.442695, %v2000_v2  ;;  %v2005_v5 = vsub.f32 %v1941_v9, %v820_v3  ;;  %885 = vadd.xlane.f32.xlu0 %v884_v4 }
 0x362   : > { %1527 = vpow2.f32 %v857_v0  ;;  %v859_v7 = vmul.f32 1.442695, %v2005_v5 }
 0x364   : > { %v1524_v8 = vpop.eup %1523  ;;  %1529 = vpow2.f32 %v859_v7 }
 0x365   : > { %v823_v10 = vpop.xlane.xlu0 %822  ;;  %v887_v11 = vsel %vm784_vm4, %v1524_v8, 0.0 }
 0x366   : > { %v1526_v6 = vpop.eup %1525  ;;  %v2010_v12 = vsub.f32 %v1948_v14, %v823_v10  ;;  %888 = vadd.xlane.f32.xlu1 %v887_v11 }
 0x367   : > { %v890_v13 = vsel %vm784_vm4, %v1526_v6, 0.0 }
 0x368   : > { %v861_v15 = vmul.f32 1.442695, %v2010_v12  ;;  %891 = vadd.xlane.f32.xlu0 %v890_v13 }
 0x36a   : > { %1531 = vpow2.f32 %v861_v15 }
 0x36c   : > { %v1528_v9 = vpop.eup %1527 }
 0x36d   : > { %v893_v16 = vsel %vm784_vm4, %v1528_v9, 0.0 }
 0x36e   : > { %v1530_v17 = vpop.eup %1529  ;;  %894 = vadd.xlane.f32.xlu1 %v893_v16 }
 0x36f   : > { %v896_v18 = vsel %vm784_vm4, %v1530_v17, 0.0 }
 0x370   : > { %897 = vadd.xlane.f32.xlu0 %v896_v18 }
 0x374   : > { %v1532_v19 = vpop.eup %1531 }
 0x375   : > { %v899_v14 = vsel %vm784_vm4, %v1532_v19, 0.0 }
 0x376   : > { %900 = vadd.xlane.f32.xlu1 %v899_v14 }
 0x3d3   : > { %v865_v21 = vpop.xlane.xlu1 %864 }
 0x3d4   : > { %1533 = vlog2.f32 %v865_v21 }
 0x3d7   : > { %v868_v22 = vpop.xlane.xlu0 %867 }
 0x3d8   : > { %1535 = vlog2.f32 %v868_v22 }
 0x3db   : > { %v871_v24 = vpop.xlane.xlu1 %870 }
 0x3dc   : > { %1537 = vlog2.f32 %v871_v24 }
 0x3de   : > { %v1534_v25 = vpop.eup %1533 }
 0x3df   : > { %v903_v27 = vmul.f32 0.6931472, %v1534_v25  ;;  %v874_v28 = vpop.xlane.xlu0 %873 }
 0x3e0   : > { %1539 = vlog2.f32 %v874_v28 }
 0x3e1   : > { %v928_v29 = vsub.f32 %v1953_v20, %v903_v27 }
 0x3e2   : > { %v1536_v32 = vpop.eup %1535 }
 0x3e3   : > { %941 = vst.msk [vmem:[%s2019_s30] sm:$0xff] %vm784_vm4, %v928_v29  ;;  %v905_v33 = vmul.f32 0.6931472, %v1536_v32  ;;  %v877_v34 = vpop.xlane.xlu1 %876 }
 0x3e4   : > { %1541 = vlog2.f32 %v877_v34 }
 0x3e5   : > { %v929_v30 = vsub.f32 %v1957_v23, %v905_v33  ;;  %v880_v35 = vpop.xlane.xlu0 %879 }
 0x3e6   : > { %v1538_v36 = vpop.eup %1537  ;;  %1543 = vlog2.f32 %v880_v35 }
 0x3e7   : > { %942 = vst.msk [vmem:[%s2019_s30 + $0x8] sm:$0xff] %vm784_vm4, %v929_v30  ;;  %v907_v20 = vmul.f32 0.6931472, %v1538_v36 }
 0x3e9   : > { %v930_v38 = vsub.f32 %v1961_v26, %v907_v20 }
 0x3ea   : > { %v1540_v39 = vpop.eup %1539 }
 0x3eb   : > { %943 = vst.msk [vmem:[%s2019_s30 + $0x10] sm:$0xff] %vm784_vm4, %v930_v38  ;;  %v909_v40 = vmul.f32 0.6931472, %v1540_v39  ;;  %v883_v41 = vpop.xlane.xlu1 %882 }
 0x3ec   : > { %1545 = vlog2.f32 %v883_v41 }
 0x3ed   : > { %v931_v42 = vsub.f32 %v1965_v31, %v909_v40  ;;  %v886_v23 = vpop.xlane.xlu0 %885 }
 0x3ee   : > { %v1542_v44 = vpop.eup %1541  ;;  %1547 = vlog2.f32 %v886_v23 }
 0x3ef   : > { %944 = vst.msk [vmem:[%s2019_s30 + $0x18] sm:$0xff] %vm784_vm4, %v931_v42  ;;  %v911_v45 = vmul.f32 0.6931472, %v1542_v44 }
 0x3f0   : > { %v1544_v46 = vpop.eup %1543 }
 0x3f1   : > { %v932_v48 = vsub.f32 %v1970_v1, %v911_v45  ;;  %v913_v26 = vmul.f32 0.6931472, %v1544_v46 }
 0x3f3   : > { %945 = vst.msk [vmem:[%s2019_s30 + $0x20] sm:$0xff] %vm784_vm4, %v932_v48  ;;  %v933_v49 = vsub.f32 %v1974_v37, %v913_v26  ;;  %v889_v50 = vpop.xlane.xlu1 %888 }
 0x3f4   : > { %1549 = vlog2.f32 %v889_v50 }
 0x3f5   : > { %946 = vst.msk [vmem:[%s2019_s30 + $0x28] sm:$0xff] %vm784_vm4, %v933_v49  ;;  %v892_v31 = vpop.xlane.xlu0 %891 }
 0x3f6   : > { %v1546_v51 = vpop.eup %1545  ;;  %1551 = vlog2.f32 %v892_v31 }
 0x3f7   : > { %v915_v52 = vmul.f32 0.6931472, %v1546_v51 }
 0x3f8   : > { %v1548_v53 = vpop.eup %1547 }
 0x3f9   : > { %v934_v55 = vsub.f32 %v1980_v43, %v915_v52  ;;  %v917_v56 = vmul.f32 0.6931472, %v1548_v53 }
 0x3fb   : > { %947 = vst.msk [vmem:[%s2019_s30 + $0x30] sm:$0xff] %vm784_vm4, %v934_v55  ;;  %v935_v1 = vsub.f32 %v1984_v47, %v917_v56  ;;  %v895_v57 = vpop.xlane.xlu1 %894 }
 0x3fc   : > { %1553 = vlog2.f32 %v895_v57 }
 0x3fd   : > { %948 = vst.msk [vmem:[%s2019_s30 + $0x38] sm:$0xff] %vm784_vm4, %v935_v1  ;;  %v898_v37 = vpop.xlane.xlu0 %897 }
 0x3fe   : > { %v1550_v59 = vpop.eup %1549  ;;  %1555 = vlog2.f32 %v898_v37 }
 0x3ff   : > { %v919_v60 = vmul.f32 0.6931472, %v1550_v59 }
 0x400   : > { %v1552_v62 = vpop.eup %1551 }
 0x401   : > { %v936_v63 = vsub.f32 %v1990_v54, %v919_v60  ;;  %v921_v43 = vmul.f32 0.6931472, %v1552_v62 }
 0x403   : > { %949 = vst.msk [vmem:[%s2019_s30 + $0x40] sm:$0xff] %vm784_vm4, %v936_v63  ;;  %v937_v61 = vsub.f32 %v1995_v58, %v921_v43  ;;  %v901_v47 = vpop.xlane.xlu1 %900 }
 0x404   : > { %1557 = vlog2.f32 %v901_v47 }
 0x405   : > { %950 = vst.msk [vmem:[%s2019_s30 + $0x48] sm:$0xff] %vm784_vm4, %v937_v61 }
 0x406   : > { %v1554_v3 = vpop.eup %1553 }
 0x407   : > { %v923_v4 = vmul.f32 0.6931472, %v1554_v3 }
 0x408   : > { %v1556_v0 = vpop.eup %1555 }
 0x409   : > { %v938_v7 = vsub.f32 %v2000_v2, %v923_v4  ;;  %v925_v8 = vmul.f32 0.6931472, %v1556_v0 }
 0x40b   : > { %951 = vst.msk [vmem:[%s2019_s30 + $0x50] sm:$0xff] %vm784_vm4, %v938_v7  ;;  %v939_v54 = vsub.f32 %v2005_v5, %v925_v8 }
 0x40d   : > { %952 = vst.msk [vmem:[%s2019_s30 + $0x58] sm:$0xff] %vm784_vm4, %v939_v54  ;;  %960 = sbr.rel (!%p1718_p4) target bundleno = 1105 (0x451), region = 52 }
 0x40e   : > { %v1558_v10 = vpop.eup %1557 }
 0x40f   : > { %v927_v11 = vmul.f32 0.6931472, %v1558_v10 }
 0x411   : > { %v940_v58 = vsub.f32 %v2010_v12, %v927_v11 }
 0x413   : > { %953 = vst.msk [vmem:[%s2019_s30 + $0x60] sm:$0xff] %vm784_vm4, %v940_v58 }
 0x414   : > { %s2164_s24 = smov (!%p963_p8, %s962_s24), 13 }
 0x415   : > { %s1257_s15 = sshll.u32 %s2164_s24, 7 }
 0x416   : > { %p1260_p9 = scmp.eq.s32.totalorder %s1257_s15, 0 }
 0x417   : > { %1559 = sdivrem.u32 (!%p1260_p9), %s2164_s24, 13 }
 0x418   : > { %971 = sbr.rel (%p1260_p9) target bundleno = 1105 (0x451), region = 56 }
 0x420   : > { %s2072_s9 = spop.drf %1559 }
 0x421   : > { %p1261_p10 = scmp.le.s32.totalorder %s2072_s9, 0 }
 0x422   : > { %s2157_s27 = smov (!%p1261_p10), %s2066_s13  ;;  %s2158_s14 = smov (!%p1261_p10), %s2019_s30 }
 0x423   : > { %1175 = sbr.rel (%p1261_p10) target bundleno = 1076 (0x434), region = 132  ;;  %s2081_s16 = smov (!%p1261_p10), 0  }
 0x424   : > { %s2083_s17 = smov (!%p1261_p10), 0  }
 0x42a LB: >> { %v1059_v2 = vld [vmem:[%s1625_s14] sm:$0xff]  ;;  %v1061_v5 = vld [vmem:[%s1625_s14 + $0x8] sm:$0xff]  ;;  %v1063_v6 = vld [vmem:[%s1625_s14 + $0x10] sm:$0xff]  ;;  %s1085_s18 = sadd.s32 1, %s1629_s16  ;;  %s1053_s17 = sadd.s32 1, %s1633_s17   ;;  %s1633_s17 = sphi %s2083_s17, %s1053_s17   ;;  %s1629_s16 = sphi %s2081_s16, %s2159_s16   ;;  %s1625_s14 = sphi %s2158_s14, %s1090_s14   ;;  %s1621_s27 = sphi %s2157_s27, %s1091_s27  }
 0x42b   : >> { %1060 = vst [vmem:[%s1621_s27] sm:$0xff] %v1059_v2  ;;  %1062 = vst [vmem:[%s1621_s27 + $0x8] sm:$0xff] %v1061_v5  ;;  %v1065_v12 = vld [vmem:[%s1625_s14 + $0x18] sm:$0xff]  ;;  %v1067_v13 = vld [vmem:[%s1625_s14 + $0x20] sm:$0xff]  ;;  %p1086_p11 = scmp.ge.s32.totalorder %s1085_s18, %s2072_s9  ;;  %p1052_p12 = scmp.ge.s32.totalorder %s1053_s17, %s2072_s9 }
 0x42c   : >> { %1064 = vst [vmem:[%s1621_s27 + $0x10] sm:$0xff] %v1063_v6  ;;  %v1069_v15 = vld [vmem:[%s1625_s14 + $0x28] sm:$0xff]  ;;  %1066 = vst [vmem:[%s1621_s27 + $0x18] sm:$0xff] %v1065_v12  ;;  %v1071_v9 = vld [vmem:[%s1625_s14 + $0x30] sm:$0xff] }
 0x42d   : >> { %1068 = vst [vmem:[%s1621_s27 + $0x20] sm:$0xff] %v1067_v13  ;;  %1070 = vst [vmem:[%s1621_s27 + $0x28] sm:$0xff] %v1069_v15  ;;  %v1073_v16 = vld [vmem:[%s1625_s14 + $0x38] sm:$0xff]  ;;  %v1075_v17 = vld [vmem:[%s1625_s14 + $0x40] sm:$0xff]  ;;  %s2166_s18 = smov (%p1086_p11, %s1085_s18), 0  ;;  %1055 = sbr.rel (!%p1052_p12) target bundleno = 1066 (0x42a), region = 138 }
 0x42e   : >> { %1072 = vst [vmem:[%s1621_s27 + $0x30] sm:$0xff] %v1071_v9  ;;  %1074 = vst [vmem:[%s1621_s27 + $0x38] sm:$0xff] %v1073_v16  ;;  %v1077_v18 = vld [vmem:[%s1625_s14 + $0x48] sm:$0xff]  ;;  %v1079_v19 = vld [vmem:[%s1625_s14 + $0x50] sm:$0xff]  ;;  %s1088_s19 = smul.u32 104, %s2166_s18  ;;  %s2159_s16 = smov %s2166_s18 }
 0x42f   : >> { %1076 = vst [vmem:[%s1621_s27 + $0x40] sm:$0xff] %v1075_v17  ;;  %v1081_v14 = vld [vmem:[%s1625_s14 + $0x58] sm:$0xff]  ;;  %1078 = vst [vmem:[%s1621_s27 + $0x48] sm:$0xff] %v1077_v18  ;;  %v1083_v21 = vld [vmem:[%s1625_s14 + $0x60] sm:$0xff] }
 0x430   : >> { %1080 = vst [vmem:[%s1621_s27 + $0x50] sm:$0xff] %v1079_v19  ;;  %1082 = vst [vmem:[%s1621_s27 + $0x58] sm:$0xff] %v1081_v14  ;;  %s1090_s14 = scalar_lea.vmem %s2019_s30, %s1088_s19 [#allocation2]  }
 0x431   : >> { %1084 = vst [vmem:[%s1621_s27 + $0x60] sm:$0xff] %v1083_v21  ;;  %s1091_s27 = scalar_lea.vmem %s2066_s13, %s1088_s19  }
 0x434 PF: > { %1561 = sdivrem.u32 %s2164_s24, 13 }
 0x435   : > { %s1262_s20 = smul.u32 104, %s2072_s9 }
 0x437   : > { %s1096_s21 = scalar_lea.vmem %s2019_s30, %s1262_s20 [#allocation2]   ;;  %s1098_s22 = scalar_lea.vmem %s2066_s13, %s1262_s20  }
 0x43d   : > { %s1562_s23 = spop.drf %1561 }
 0x43e   : > { %p1264_p13 = scmp.le.s32.totalorder %s1562_s23, 0 }
 0x43f   : > { %s1635_s26 = smov (!%p1264_p13), %s1098_s22   ;;  %s1639_s29 = smov (!%p1264_p13), %s1096_s21  }
 0x440   : > { %1189 = sbr.rel (%p1264_p13) target bundleno = 1105 (0x451), region = 143  ;;  %s1643_s10 = smov (!%p1264_p13), 0  }
 0x441   : > { %s1647_s11 = smov (!%p1264_p13), 0  }
 0x447 LB: >> { %v1108_v22 = vld [vmem:[%s1641_s29] sm:$0xff]  ;;  %s1110_s12 = sadd.s32 1, %s1645_s10  ;;  %s1102_s11 = sadd.s32 1, %s1649_s11   ;;  %s1649_s11 = sphi %s1647_s11, %s1102_s11   ;;  %s1645_s10 = sphi %s1643_s10, %s1644_s10   ;;  %s1641_s29 = sphi %s1639_s29, %s1115_s29   ;;  %s1637_s26 = sphi %s1635_s26, %s1116_s26  }
 0x448   : >> { %1109 = vst [vmem:[%s1637_s26] sm:$0xff] %v1108_v22  ;;  %p1111_p0 = scmp.ge.s32.totalorder %s1110_s12, %s1562_s23  ;;  %p1101_p1 = scmp.ge.s32.totalorder %s1102_s11, %s1562_s23 }
 0x44a   : >> { %s2168_s12 = smov (%p1111_p0, %s1110_s12), 0  ;;  %1104 = sbr.rel (!%p1101_p1) target bundleno = 1095 (0x447), region = 149 }
 0x44b   : >> { %s1265_s30 = sshll.u32 %s2168_s12, 3  ;;  %s1644_s10 = smov %s2168_s12  }
 0x44c   : >> { %s1115_s29 = scalar_lea.vmem %s1096_s21, %s1265_s30 [#allocation2]   ;;  %s1116_s26 = scalar_lea.vmem %s1098_s22, %s1265_s30  }
 0x451 PF: > { %p14_p2 = scmp.ge.s32.totalorder %s1708_s28, 4   ;;  %s2160_s24 = smov %s1613_s25 }
 0x452   : > { %s2161_s25 = smov %s1716_s8  ;;  %s2162_s26 = smov %s1708_s28 }
 0x453   :  { %16 = sbr.rel (!%p14_p2) target bundleno = 2 (0x2), region = 160 }

</bundles_post_ra>
